<compile_context>
chip_gen: v5e
topology: v5e:2x2
jax: 0.10.0
libtpu: 0.0.40
codegen_flags: <defaults>
</compile_context>

<pallas_src>
import jax
import jax.numpy as jnp
from jax.experimental import pallas as pl
from jax.experimental.pallas import tpu as pltpu


def _round_up(a: int, m: int) -> int:
    return ((a + m - 1) // m) * m


def _cdiv(a: int, b: int) -> int:
    return (a + b - 1) // b


def _mlp_kernel(x_ref, w1_ref, b1_ref, w2_ref, b2_ref, o_ref):
    # fc1 on the MXU: (tb, IN) @ (IN, Hp) -> (tb, Hp), f32 accumulation
    # (bf16 inputs take the bf16 MXU path; accumulation is still f32).
    h = jnp.dot(x_ref[...], w1_ref[...], preferred_element_type=jnp.float32)
    # bias + ReLU on the VPU, in f32 (v5e has no bf16 VPU/EUP).
    h = jnp.maximum(h + b1_ref[...], 0.0)

    # fc2: contract the hidden (lane) axis of h against the single output
    # column stored as a (1, Hp) row.  Both operands contract their LAST dim
    # (the q @ k^T flash-attention pattern), which Mosaic feeds to the MXU as a
    # transposed-rhs matmul — no XLU vxpose of the (tb, Hp) h tile — and the
    # result lands lane-major as (1, tb) so the store below is an unmasked,
    # full-width vst.
    z = jax.lax.dot_general(
        w2_ref[...], h,
        dimension_numbers=(((1,), (1,)), ((), ())),
        preferred_element_type=jnp.float32,
    )                                   # (1, tb)

    # scalar fc2 bias from SMEM.
    z = z + b2_ref[0]

    # sigmoid: exp on the EUP; reciprocal also routed to the EUP slot.
    o_ref[...] = pl.reciprocal(1.0 + jnp.exp(-z), approx=True).astype(o_ref.dtype)


def _choose_batch_tile(B, in_features, Hp, x_itemsize, batch_tile, vmem_limit):
    """Pick the batch tile.

    Big enough that per-grid-step overhead is amortized, small enough to fit
    the VMEM budget (also valid on v7x: 64 MiB physical / 32 MiB scoped), a
    multiple of 128 so the (1, tb) output store is lane-dense, and split so a
    single-tile grid doesn't idle one of v7x's two TensorCores.
    """
    if B <= 128:
        # Tiny batch: one tile equal to the full batch dim (block == full dim
        # always satisfies the (8,128) rule; masked store cost is negligible).
        return B

    # Resident weights: w1 + b1 + w2 row.  Budget 2x since Pallas allocates a
    # second (unused) buffer for constant-index_map operands by default.
    resident = 2 * (in_features * Hp * x_itemsize + 2 * Hp * 4)
    # Per batch row of VMEM: double-buffered x tile + the f32 h tile.
    per_row = 2 * in_features * x_itemsize + 2 * Hp * 4
    budget = vmem_limit - resident - (4 << 20)        # 4 MiB headroom for temps
    tb_budget = max(128, (budget // per_row) // 128 * 128)

    tb = min(batch_tile, tb_budget, _round_up(B, 128))
    tb = max(128, (tb // 128) * 128)

    if _cdiv(B, tb) == 1:
        # v7x has 2 TensorCores per chip; a single-tile "parallel" grid would
        # leave one idle.  Split into (at least) two tiles.
        tb = max(128, _round_up(_cdiv(B, 2), 128))
    return tb


def source_classifier_forward(x, w1, b1, w2, b2, *, batch_tile=4096,
                              vmem_limit_bytes=32 * 1024 * 1024):
    """Forward pass of SourceClassifier.

    x : (B, input_size)       activations — pass bf16 end-to-end for a ~2x
                              HBM-stream win on v6e/v7x (f32 also supported)
    w1: (input_size, hidden)  fc1 weight, stored (in, out) (transposed vs torch)
    b1: (hidden,)             fc1 bias
    w2: (hidden, 1)           fc2 weight, stored (in, out)
    b2: (1,)                  fc2 bias
    returns (B, 1) f32 sigmoid probabilities.
    """
    B, in_features = x.shape
    H = w1.shape[1]
    O = w2.shape[1]
    if O != 1:
        # TODO(synk): generalize the lane-dense output path to output_size > 1
        # (the module spec uses output_size=1).
        raise NotImplementedError("SourceClassifier kernel assumes output_size == 1")

    # --- hidden padding to a lane-dense multiple of 128 (zero pad => identical math).
    Hp = max(128, _round_up(H, 128))
    w1 = w1.astype(x.dtype)                               # fc1 matmul dtype follows x
    b1 = jnp.asarray(b1, jnp.float32).reshape(1, H)
    w2 = jnp.asarray(w2, jnp.float32)
    if Hp != H:
        w1 = jnp.pad(w1, ((0, 0), (0, Hp - H)))
        b1 = jnp.pad(b1, ((0, 0), (0, Hp - H)))
        w2 = jnp.pad(w2, ((0, Hp - H), (0, 0)))
    w2_row = w2.reshape(1, Hp)                            # output column as a row
    b2 = jnp.asarray(b2, jnp.float32).reshape(1)          # scalar -> SMEM

    # --- batch tiling: pipeline x / out over a 1-D grid; weights stay resident.
    # NOTE: x is NOT padded — the last batch tile is ragged and the garbage
    # rows it computes are sliced off below (per-row independent math).
    x_item = jnp.dtype(x.dtype).itemsize
    tb = _choose_batch_tile(B, in_features, Hp, x_item, batch_tile, vmem_limit_bytes)
    G = _cdiv(B, tb)

    cost = pl.CostEstimate(
        flops=2 * B * in_features * Hp + 2 * B * Hp,
        transcendentals=B,
        bytes_accessed=B * in_features * x_item
        + in_features * Hp * x_item + 3 * Hp * 4 + B * 4,
    )

    out_rows = pl.pallas_call(
        _mlp_kernel,
        out_shape=jax.ShapeDtypeStruct((G, tb), jnp.float32),
        grid=(G,),
        in_specs=[
            pl.BlockSpec((tb, in_features), lambda i: (i, 0)),   # x tile (pipelined)
            pl.BlockSpec((in_features, Hp), lambda i: (0, 0)),   # w1 (resident)
            pl.BlockSpec((1, Hp), lambda i: (0, 0)),             # b1 (resident)
            pl.BlockSpec((1, Hp), lambda i: (0, 0)),             # w2 row (resident)
            pl.BlockSpec(memory_space=pltpu.MemorySpace.SMEM),   # b2 scalar
        ],
        out_specs=pl.BlockSpec((1, tb), lambda i: (i, 0)),       # lane-dense rows
        compiler_params=pltpu.CompilerParams(
            dimension_semantics=("parallel",),     # shard batch tiles across TCs (v7x)
            vmem_limit_bytes=vmem_limit_bytes,     # safe on v5e/v6e/v7x
        ),
        cost_estimate=cost,
    )(x, w1, b1, w2_row, b2)

    # Rows of (G, tb) are batch-major; flatten, drop ragged-tile garbage,
    # present as the PyTorch (B, 1) shape.
    return out_rows.reshape(-1)[:B].reshape(B, 1)


def init_params(key, input_size=128, hidden_size=64, output_size=1, dtype=jnp.float32):
    """PyTorch nn.Linear default init (uniform +-1/sqrt(fan_in)); weights stored (in, out)."""
    k1, k2, k3, k4 = jax.random.split(key, 4)
    bound1 = 1.0 / (input_size ** 0.5)
    bound2 = 1.0 / (hidden_size ** 0.5)
    w1 = jax.random.uniform(k1, (input_size, hidden_size), jnp.float32, -bound1, bound1)
    b1 = jax.random.uniform(k2, (hidden_size,), jnp.float32, -bound1, bound1)
    w2 = jax.random.uniform(k3, (hidden_size, output_size), jnp.float32, -bound2, bound2)
    b2 = jax.random.uniform(k4, (output_size,), jnp.float32, -bound2, bound2)
    return w1.astype(dtype), b1, w2, b2


def _reference(x, w1, b1, w2, b2):
    xf = x.astype(jnp.float32)
    h = jnp.maximum(xf @ w1.astype(jnp.float32) + b1.reshape(1, -1), 0.0)
    z = h @ w2 + b2.reshape(1, -1)
    return jax.nn.sigmoid(z)


if __name__ == "__main__":
    key = jax.random.PRNGKey(0)
    k_x, k_p, k_x2 = jax.random.split(key, 3)

    input_size, hidden_size, output_size = 128, 64, 1
    w1, b1, w2, b2 = init_params(k_p, input_size, hidden_size, output_size)

    # 1) tiny batch: single tile equal to the batch dim.
    x_small = jax.random.normal(k_x, (8, input_size), jnp.float32)
    out_small = jax.block_until_ready(source_classifier_forward(x_small, w1, b1, w2, b2))
    ref_small = _reference(x_small, w1, b1, w2, b2)
    assert out_small.shape == (8, output_size)
    assert jnp.allclose(out_small, ref_small, atol=5e-3), "f32 small-batch mismatch"

    # 2) default tiling: VMEM-derived tb, split into 2 tiles (v7x both-TC rule),
    #    ragged last tile, NO wrapper-side padding of x.
    x_big = jax.random.normal(k_x2, (300, input_size), jnp.float32)
    out_big = jax.block_until_ready(source_classifier_forward(x_big, w1, b1, w2, b2))
    ref_big = _reference(x_big, w1, b1, w2, b2)
    assert out_big.shape == (300, output_size)
    assert jnp.allclose(out_big, ref_big, atol=5e-3), "f32 default-tiling mismatch"

    # 2b) forced small tile: 3 batch tiles, last one ragged.
    out_3t = jax.block_until_ready(
        source_classifier_forward(x_big, w1, b1, w2, b2, batch_tile=128))
    assert out_3t.shape == (300, output_size)
    assert jnp.allclose(out_3t, ref_big, atol=5e-3), "f32 multi-tile mismatch"

    # 3) bf16 activations / fc1 weights end-to-end (MXU fast path), f32 epilogue.
    out_bf16 = jax.block_until_ready(
        source_classifier_forward(
            x_big.astype(jnp.bfloat16), w1.astype(jnp.bfloat16), b1, w2, b2))
    assert out_bf16.shape == (300, output_size)
    assert jnp.allclose(out_bf16, ref_big, atol=3e-2), "bf16 mismatch"

    print("KERNEL_OK")
</pallas_src>

<mosaic_0001>
module attributes {stable_mosaic.version = 11 : i64} {
  func.func @_mlp_kernel(%arg0: i32, %arg1: memref<8x128xf32, #tpu.memory_space<vmem>>, %arg2: memref<128x128xf32, #tpu.memory_space<vmem>>, %arg3: memref<1x128xf32, #tpu.memory_space<vmem>>, %arg4: memref<1x128xf32, #tpu.memory_space<vmem>>, %arg5: memref<1xf32, #tpu.memory_space<smem>>, %arg6: memref<1x8xf32, #tpu.memory_space<vmem>>) attributes {dimension_semantics = [#tpu.dimension_semantics<parallel>], iteration_bounds = array<i64: 1>, scalar_prefetch = 0 : i64, scratch_operands = 0 : i64, tpu.core_type = #tpu.core_type<tc>, window_params = [{transform_indices = @transform_0, window_bounds = array<i64: 8, 128>}, {pipeline_mode = #tpu.pipeline_mode<synchronous>, transform_indices = @transform_1, window_bounds = array<i64: 128, 128>}, {pipeline_mode = #tpu.pipeline_mode<synchronous>, transform_indices = @transform_2, window_bounds = array<i64: 1, 128>}, {pipeline_mode = #tpu.pipeline_mode<synchronous>, transform_indices = @transform_3, window_bounds = array<i64: 1, 128>}, {transform_indices = @transform_4, window_bounds = array<i64: 1>}, {transform_indices = @transform_5, window_bounds = array<i64: 1, 8>}]} {
    %c0 = arith.constant 0 : index
    %c0_0 = arith.constant 0 : index
    %0 = vector.load %arg1[%c0, %c0_0] : memref<8x128xf32, #tpu.memory_space<vmem>>, vector<8x128xf32>
    %c0_1 = arith.constant 0 : index
    %c0_2 = arith.constant 0 : index
    %1 = vector.load %arg2[%c0_1, %c0_2] : memref<128x128xf32, #tpu.memory_space<vmem>>, vector<128x128xf32>
    %cst = arith.constant dense<0.000000e+00> : vector<8x128xf32>
    %2 = tpu.matmul %0, %1, %cst {dimension_numbers = #tpu.dot_dimension_numbers<[1], [0], [0], [1], [0, 0, 1, 1], [], []>} : vector<8x128xf32>, vector<128x128xf32>, vector<8x128xf32> -> vector<8x128xf32>
    %c0_3 = arith.constant 0 : index
    %c0_4 = arith.constant 0 : index
    %3 = vector.load %arg3[%c0_3, %c0_4] : memref<1x128xf32, #tpu.memory_space<vmem>>, vector<1x128xf32>
    %4 = vector.broadcast %3 : vector<1x128xf32> to vector<8x128xf32>
    %5 = arith.addf %2, %4 : vector<8x128xf32>
    %cst_5 = arith.constant 0.000000e+00 : f32
    %6 = vector.broadcast %cst_5 : f32 to vector<8x128xf32>
    %7 = arith.maximumf %5, %6 : vector<8x128xf32>
    %c0_6 = arith.constant 0 : index
    %c0_7 = arith.constant 0 : index
    %8 = vector.load %arg4[%c0_6, %c0_7] : memref<1x128xf32, #tpu.memory_space<vmem>>, vector<1x128xf32>
    %cst_8 = arith.constant dense<0.000000e+00> : vector<1x8xf32>
    %9 = tpu.matmul %8, %7, %cst_8 {dimension_numbers = #tpu.dot_dimension_numbers<[1], [1], [0], [0], [0, 0, 1, 0], [], []>} : vector<1x128xf32>, vector<8x128xf32>, vector<1x8xf32> -> vector<1x8xf32>
    %c0_9 = arith.constant 0 : index
    %10 = memref.load %arg5[%c0_9] : memref<1xf32, #tpu.memory_space<smem>>
    %11 = vector.broadcast %10 : f32 to vector<1x8xf32>
    %12 = arith.addf %9, %11 : vector<1x8xf32>
    %cst_10 = arith.constant 0.000000e+00 : f32
    %13 = vector.broadcast %cst_10 : f32 to vector<1x8xf32>
    %14 = arith.subf %13, %12 : vector<1x8xf32>
    %15 = math.exp %14 : vector<1x8xf32>
    %cst_11 = arith.constant 1.000000e+00 : f32
    %16 = vector.broadcast %cst_11 : f32 to vector<1x8xf32>
    %17 = arith.addf %16, %15 : vector<1x8xf32>
    %18 = tpu.reciprocal %17 {approx = true} : vector<1x8xf32> -> vector<1x8xf32>
    %c0_12 = arith.constant 0 : index
    %c0_13 = arith.constant 0 : index
    %19 = vector.load %arg6[%c0_12, %c0_13] : memref<1x8xf32, #tpu.memory_space<vmem>>, vector<1x8xf32>
    tpu.vector_store %arg6[%c0_12, %c0_13], %18 {strides = array<i32>} : memref<1x8xf32, #tpu.memory_space<vmem>>, vector<1x8xf32>,
    return
  }
  func.func @transform_0(%arg0: i32) -> (i32, i32) {
    %c0_i32 = arith.constant 0 : i32
    %c0_i32_0 = arith.constant 0 : i32
    return %arg0, %c0_i32 : i32, i32
  }
  func.func @transform_1(%arg0: i32) -> (i32, i32) {
    %c0_i32 = arith.constant 0 : i32
    %c0_i32_0 = arith.constant 0 : i32
    %c0_i32_1 = arith.constant 0 : i32
    return %c0_i32, %c0_i32_0 : i32, i32
  }
  func.func @transform_2(%arg0: i32) -> (i32, i32) {
    %c0_i32 = arith.constant 0 : i32
    %c0_i32_0 = arith.constant 0 : i32
    %c0_i32_1 = arith.constant 0 : i32
    return %c0_i32, %c0_i32_0 : i32, i32
  }
  func.func @transform_3(%arg0: i32) -> (i32, i32) {
    %c0_i32 = arith.constant 0 : i32
    %c0_i32_0 = arith.constant 0 : i32
    %c0_i32_1 = arith.constant 0 : i32
    return %c0_i32, %c0_i32_0 : i32, i32
  }
  func.func @transform_4(%arg0: i32) -> i32 {
    %c0_i32 = arith.constant 0 : i32
    %c0_i32_0 = arith.constant 0 : i32
    return %c0_i32 : i32
  }
  func.func @transform_5(%arg0: i32) -> (i32, i32) {
    %c0_i32 = arith.constant 0 : i32
    %c0_i32_0 = arith.constant 0 : i32
    return %arg0, %c0_i32 : i32, i32
  }
}

</mosaic_0001>

<bundles_post_ra>
// kernel: tpu_custom_call.1
= control target key start
LH: loop header
LB: loop body
LE: loop exit
PB: predicated region body
PF: predicated region fallthrough
CT: control target
= control target key end

     0   :  { %11 = vsyncpa [#allocation4], 0  ;;  %s283_s0 = inlined_call_operand.hbm [shape: f32[8,128], index: 0, kind: input, shape index: {}]   ;;  %s284_s1 = inlined_call_operand.hbm [shape: f32[128,128], index: 1, kind: input, shape index: {}]   ;;  %s285_s2 = inlined_call_operand.vmem [shape: f32[1,128], index: 2, kind: input, shape index: {}]   ;;  %s286_s3 = inlined_call_operand.vmem [shape: f32[1,128], index: 3, kind: input, shape index: {}]   ;;  %s287_s4 = inlined_call_operand.<no memory space> [shape: f32[1], index: 4, kind: input, shape index: {}]   ;;  %s288_s5 = inlined_call_operand.hbm [shape: f32[1,8], index: 5, kind: output, shape index: {}]  }
   0x1   :  { %12 = vsyncpa [#allocation7], 0 }
   0x2   :  { %13 = vsyncpa [#allocation5], 0  ;;  %s19_s20 = sshll.u32 %s283_s0, 4  ;;  %s230_s21 = smov [#allocation3]   ;;  %s20_s20 = int_to_ptr.hbm [resolvable:$true] %s19_s20 }
   0x3   :  { %s21_s22 = sshll.u32 %s230_s21, 4  ;;  %s29_s25 = sshll.u32 %s284_s1, 4  ;;  %s22_s22 = int_to_ptr.vmem [resolvable:$true] %s21_s22  ;;  %s30_s25 = int_to_ptr.hbm [resolvable:$true] %s29_s25 }
   0x4   :  { %24 = dma.hbm_to_vmem [thread:$0]  %s20_s20, 128, %s22_s22, [#allocation4]  }
   0x5   :  { %s231_s26 = smov [#allocation6]   ;;  %s232_s28 = smov 128  }
   0x6   :  { %s31_s27 = sshll.u32 %s231_s26, 4  ;;  %s233_s29 = smov 8   ;;  %s32_s27 = int_to_ptr.vmem [resolvable:$true] %s31_s27 }
   0x7   :  { %37 = dma.hbm_to_vmem [thread:$0]  %s30_s25, 2048, %s32_s27, [#allocation7], %s232_s28, %s232_s28, %s233_s29  }
   0x8   :  { %224 = dma.done.wait [#allocation4], 128  }
   0x9   :  { %225 = vsyncadd [#allocation4], 4294967168 }
   0xa   :  { %226 = dma.done.wait [#allocation7], 2048  }
   0xb   :  { %227 = vsyncadd [#allocation7], 4294965248  ;;  %v68_v0 = vld [vmem:[#allocation6 + $0x78] sm:$0xff]  ;;  %v67_v1 = vld [vmem:[#allocation6 + $0x70] sm:$0xff]  ;;  %v96_v22 = vstv %s287_s4  ;;  %s131_s12 = sshll.u32 %s288_s5, 4  ;;  %vm122_vm0 = vcmask 57344   ;;  %s132_s12 = int_to_ptr.hbm [resolvable:$true] %s131_s12 }
   0xc   :  { %73 = vmatpush.msra.mxu0 %v68_v0  ;;  %v66_v2 = vld [vmem:[#allocation6 + $0x68] sm:$0xff]  ;;  %v65_v3 = vld [vmem:[#allocation6 + $0x60] sm:$0xff]  ;;  %v64_v4 = vld [vmem:[#allocation6 + $0x58] sm:$0xff] }
   0xd   :  { %v63_v5 = vld [vmem:[#allocation6 + $0x50] sm:$0xff]  ;;  %v62_v6 = vld [vmem:[#allocation6 + $0x48] sm:$0xff]  ;;  %v61_v7 = vld [vmem:[#allocation6 + $0x40] sm:$0xff] }
   0xe   :  { %74 = vmatpush.msra.mxu0 %v67_v1  ;;  %v60_v8 = vld [vmem:[#allocation6 + $0x38] sm:$0xff]  ;;  %v59_v9 = vld [vmem:[#allocation6 + $0x30] sm:$0xff]  ;;  %v58_v10 = vld [vmem:[#allocation6 + $0x28] sm:$0xff] }
   0xf   :  { %v57_v11 = vld [vmem:[#allocation6 + $0x20] sm:$0xff]  ;;  %v56_v12 = vld [vmem:[#allocation6 + $0x18] sm:$0xff]  ;;  %v55_v13 = vld [vmem:[#allocation6 + $0x10] sm:$0xff] }
  0x10   :  { %75 = vmatpush.msra.mxu0 %v66_v2  ;;  %v54_v14 = vld [vmem:[#allocation6 + $0x8] sm:$0xff]  ;;  %v53_v15 = vld [vmem:[#allocation6] sm:$0xff]  ;;  %v52_v16 = vld [vmem:[#allocation3] sm:$0xff] }
  0x11   :  { %v147_v17 = vld [vmem:[%s285_s2] ss:$0 sm:$0xff]  ;;  %s234_s2 = smov [#allocation8]  }
  0x12   :  { %76 = vmatpush.msra.mxu0 %v65_v3  ;;  %v94_v21 = vld [vmem:[%s286_s3] sm:$0x1]  ;;  %s129_s9 = sshll.u32 %s234_s2, 4  ;;  %s130_s9 = int_to_ptr.vmem [resolvable:$true] %s129_s9 }
  0x14   :  { %77 = vmatpush.msra.mxu0 %v64_v4 }
  0x16   :  { %78 = vmatpush.msra.mxu0 %v63_v5 }
  0x18   :  { %79 = vmatpush.msra.mxu0 %v62_v6 }
  0x1a   :  { %80 = vmatpush.msra.mxu0 %v61_v7 }
  0x1c   :  { %81 = vmatpush.msra.mxu0 %v60_v8 }
  0x1e   :  { %82 = vmatpush.msra.mxu0 %v59_v9 }
  0x20   :  { %83 = vmatpush.msra.mxu0 %v58_v10 }
  0x22   :  { %84 = vmatpush.msra.mxu0 %v57_v11 }
  0x24   :  { %85 = vmatpush.msra.mxu0 %v56_v12 }
  0x26   :  { %86 = vmatpush.msra.mxu0 %v55_v13 }
  0x28   :  { %87 = vmatpush.msra.mxu0 %v54_v14 }
  0x2a   :  { %88 = vmatpush.msra.mxu0 %v53_v15 }
  0x2b   :  { %89 = vmatmul.f32.vlgmr.msra.gmra.mxu0 %v52_v16 }
  0xa8   :  { %v90_v18 = vpop.f32.mrf.mxu0 }
  0xa9   :  { %v91_v19 = vadd.f32 %v147_v17, %v90_v18 }
  0xab   :  { %v93_v20 = vmax.f32 %v91_v19, 0.0 }
  0xad   :  { %112 = vmatpush.xpose.msra.mxu1 %v93_v20 }
  0xb0   :  { %113 = vmatmul.f32.vlgmr.msra.gmra.mxu1 %v94_v21 }
 0x12d   :  { %v114_v23 = vpop.f32.mrf.mxu1 }
 0x12e   :  { %v115_v24 = vadd.f32 %v114_v23, %v96_v22 }
 0x130   :  { %v117_v25 = vsub.f32 0.0, %v115_v24 }
 0x132   :  { %v118_v26 = vmul.f32 1.442695, %v117_v25 }
 0x134   :  { %148 = vpow2.f32 %v118_v26 }
 0x13a   :  { %v149_v27 = vpop.eup %148 }
 0x13b   :  { %v120_v28 = vadd.f32 1.0, %v149_v27 }
 0x13d   :  { %150 = vrcp.f32 %v120_v28 }
 0x143   :  { %v151_v29 = vpop.eup %150 }
 0x144   :  { %123 = vst.msk [vmem:[#allocation8] sm:$0x1] %vm122_vm0, %v151_v29 }
 0x145   :  { %134 = dma.vmem_to_hbm [thread:$0]  %s130_s9, 16, %s132_s12, [#allocation5]  }
 0x146   :  { %228 = dma.done.wait [#allocation5], 16  }
 0x147   :  { %229 = vsyncadd [#allocation5], 4294967280 }
 0x148   :  { %139 = vsyncpa [#allocation4], 1 }
 0x149   :  { %140 = vsyncpa [#allocation7], 1 }
 0x14a   :  { %141 = vsyncpa [#allocation5], 1 }

</bundles_post_ra>
